<compile_context>
chip_gen: v6e
topology: v6e:2x2x1
jax: 0.10.0
libtpu: 0.0.40
codegen_flags: <defaults>
</compile_context>

<pallas_src>
import math

import jax
import jax.numpy as jnp
from jax.experimental import pallas as pl
from jax.experimental.pallas import tpu as pltpu


_SQRT_HALF = 0.7071067811865476
_LANE = 128
_MXU_M = 256              # MXU-friendly row-block multiple (v6e/v7x 256x256 MXU)
_MAX_BM = 1024
_MAX_BK = 1024
_ROW_BLOCKS_TARGET = 8    # >= 4 pipeline steps per core on a 2-core (v7x) chip
_MIN_BM_FOR_STEPS = 512   # never shrink blocks below this just for step count


# ----------------------------- in-kernel math ------------------------------

def _erf_f32(z):
    # Abramowitz & Stegun 7.1.26 polynomial (max abs err ~1.5e-7).
    az = jnp.abs(z)
    d = 1.0 + 0.3275911 * az
    t = pl.reciprocal(d, approx=True)   # EUP slot (cheap)
    t = t * (2.0 - d * t)               # one Newton step -> ~full f32 accuracy
    poly = t * (0.254829592
                + t * (-0.284496736
                       + t * (1.421413741
                              + t * (-1.453152027 + t * 1.061405429))))
    e = 1.0 - poly * jnp.exp(-az * az)
    return jnp.where(z < 0, -e, e)


def _gelu_exact(x):
    # Matches torch.nn.GELU() default (exact / erf form).
    return 0.5 * x * (1.0 + _erf_f32(x * _SQRT_HALF))


def _mlp_compute(x_ref, w1_ref, w2_ref, o_ref, acc_ref, b1_ref, b2_ref):
    k = pl.program_id(1)

    @pl.when(k == 0)
    def _():
        acc_ref[...] = jnp.zeros_like(acc_ref)

    h = jnp.dot(x_ref[...], w1_ref[...], preferred_element_type=jnp.float32)
    if b1_ref is not None:
        h = h + b1_ref[...].astype(jnp.float32)
    h = _gelu_exact(h)
    acc_ref[...] += jnp.dot(h.astype(w2_ref.dtype), w2_ref[...],
                            preferred_element_type=jnp.float32)

    @pl.when(k == pl.num_programs(1) - 1)
    def _():
        y = acc_ref[...]
        if b2_ref is not None:
            y = y + b2_ref[...].astype(jnp.float32)
        o_ref[...] = y.astype(o_ref.dtype)


def _mlp_kernel_bias(x_ref, w1_ref, b1_ref, w2_ref, b2_ref, o_ref, acc_ref):
    _mlp_compute(x_ref, w1_ref, w2_ref, o_ref, acc_ref, b1_ref, b2_ref)


def _mlp_kernel_nobias(x_ref, w1_ref, w2_ref, o_ref, acc_ref):
    _mlp_compute(x_ref, w1_ref, w2_ref, o_ref, acc_ref, None, None)


# ------------------------------ tile sizing --------------------------------

def _sublane_tile(dtype):
    return max(8, 32 // jnp.dtype(dtype).itemsize)


def _round_up(v, m):
    return -(-v // m) * m


def _vmem_capacity_bytes():
    """Per-TensorCore VMEM capacity, conservatively clamped.

    v5e/v6e have 128 MiB per TensorCore; v7x has 64 MiB per TensorCore (2 TCs
    per chip, the row grid is sharded across them by "parallel").  If the
    runtime query fails or the generation can't be determined, assume the
    v7x 64 MiB figure so the vmem_limit never exceeds physical per-core VMEM.
    """
    mib = 1024 * 1024
    cap, gen = None, ""
    try:
        info = pltpu.get_tpu_info()
        cap = int(getattr(info, "vmem_capacity_bytes", 0)) or None
        for attr in ("chip_version", "version", "generation", "chip_name", "name"):
            v = getattr(info, attr, None)
            if v is not None:
                gen = str(v)
                break
    except Exception:
        pass
    gen = gen.lower()
    if ("7" not in gen) and any(s in gen for s in ("v5", "v6", "5e", "5p", "6e")):
        per_core_max = 128 * mib       # v5e / v6e
    else:
        per_core_max = 64 * mib        # v7x or unknown: be safe
    if cap is None:
        cap = per_core_max
    return min(cap, per_core_max)


def _choose_tiles(rows, c_in, c_hid, c_out, x_dtype, w_dtype, out_dtype,
                  has_bias, block_m=None, block_k=None):
    tile = _sublane_tile(x_dtype)
    cap = _vmem_capacity_bytes()
    budget = (cap * 3) // 5            # ~60% of per-core VMEM for block sizing
    vmem_limit = (cap * 17) // 20      # 85% -- headroom for compiler scratch

    isz = jnp.dtype(x_dtype).itemsize
    osz = jnp.dtype(out_dtype).itemsize
    wsz = jnp.dtype(w_dtype).itemsize

    # --- hidden-dim block (bk): stream W1 columns / W2 rows so the per-step
    # weight footprint never forces tiny row blocks or a VMEM OOM.
    if c_hid % _LANE == 0 and c_hid > _LANE:
        # Keep (double-buffered) weight blocks to roughly a third of the budget.
        bk_cap = (budget // 3) // max(1, 2 * (c_in + c_out + 1) * wsz)
        bk_cap = min(_MAX_BK, c_hid, max(_LANE, (bk_cap // _LANE) * _LANE))
        bk = _LANE
        d = (bk_cap // _LANE) * _LANE
        while d >= _LANE:              # largest 128-multiple divisor of c_hid
            if c_hid % d == 0:
                bk = d
                break
            d -= _LANE
    else:
        # Tiny / non-128-multiple hidden dims: single k step, weights resident.
        bk = c_hid
    if (block_k is not None and 0 < block_k <= c_hid and c_hid % block_k == 0
            and (block_k % _LANE == 0 or block_k == c_hid)):
        bk = block_k                   # test / tuning override
    nk = max(1, c_hid // bk)

    # --- row block (bm): biggest block the remaining VMEM budget allows.
    wblk = (c_in * bk + bk * c_out + (bk if has_bias else 0)) * wsz
    fixed = 2 * wblk + (c_out * wsz if has_bias else 0)   # weights counted 2x-buffered
    per_row = (2 * c_in * isz              # x block (double-buffered)
               + 2 * c_out * osz           # out block (double-buffered)
               + 4 * c_out                 # f32 accumulator scratch
               + 4 * (2 * bk + c_out)      # f32 intermediates (h, gelu, partial y)
               + bk * wsz)                 # h cast to the matmul dtype
    avail = max(budget - fixed, per_row * tile)
    bm = int(avail // per_row)
    bm = min(bm, _MAX_BM)
    # Aim for >= _ROW_BLOCKS_TARGET row blocks so x DMA / output writeback are
    # pipelined away, but never shrink below ~512 rows just for step count.
    steps_cap = max(_MIN_BM_FOR_STEPS, -(-rows // _ROW_BLOCKS_TARGET))
    bm = min(bm, steps_cap)
    if bm >= _MXU_M:
        bm = (bm // _MXU_M) * _MXU_M       # MXU-friendly multiple of 256
    else:
        bm = max(tile, (bm // tile) * tile)
    bm = min(bm, max(tile, _round_up(rows, tile)))   # no block larger than all rows
    if block_m is not None and block_m > 0:
        bm = max(tile, _round_up(block_m, tile))     # test / tuning override
    return bm, bk, nk, int(vmem_limit)


# -------------------------------- wrappers ----------------------------------

def prepare_mlp_params(w_fc, b_fc, w_proj, b_proj):
    """One-time parameter prep: transpose torch-layout Linear weights.

    Do this at parameter-setup time (not per forward call) so jitted steps do
    not pay a full HBM read+write of both weight matrices before the kernel.
    """
    return {
        "w1": jnp.transpose(w_fc),                        # (n_embd, 4*n_embd)
        "w2": jnp.transpose(w_proj),                      # (4*n_embd, n_embd)
        "b1": None if b_fc is None else b_fc.reshape(1, -1),
        "b2": None if b_proj is None else b_proj.reshape(1, -1),
    }


def mlp_apply(x, params, *, dropout_p=0.0, training=False,
              block_m=None, block_k=None):
    """Fused MLP forward using prepared (pre-transposed) parameters."""
    if training and dropout_p > 0.0:
        # TODO(synk): training-mode dropout (in-kernel pltpu.prng_* masking) not implemented.
        raise NotImplementedError("training-mode dropout not implemented")

    w1, w2, b1, b2 = params["w1"], params["w2"], params["b1"], params["b2"]
    c_in, c_hid = w1.shape
    c_hid2, c_out = w2.shape
    assert c_hid2 == c_hid

    orig_shape = x.shape
    assert orig_shape[-1] == c_in
    rows = math.prod(orig_shape[:-1]) if len(orig_shape) > 1 else 1
    x2 = x.reshape(rows, c_in)

    has_bias = b1 is not None
    bm, bk, nk, vmem_limit = _choose_tiles(
        rows, c_in, c_hid, c_out, x.dtype, w1.dtype, x.dtype, has_bias,
        block_m=block_m, block_k=block_k)

    # Pad rows to whole blocks -> unmasked (sublane,lane)-aligned blocks.
    rows_p = _round_up(rows, bm)
    if rows_p != rows:
        x2 = jnp.pad(x2, ((0, rows_p - rows), (0, 0)))
    grid_m = rows_p // bm
    grid = (grid_m, nk)

    wsz = jnp.dtype(w1.dtype).itemsize
    cost = pl.CostEstimate(
        flops=int(2 * rows_p * (c_in * c_hid + c_hid * c_out)),
        transcendentals=int(rows_p * c_hid),
        bytes_accessed=int(
            rows_p * c_in * x.dtype.itemsize
            + rows_p * c_out * x.dtype.itemsize
            + grid_m * (c_in * c_hid + c_hid * c_out) * wsz
            + ((c_hid + c_out) * wsz if has_bias else 0)),
    )

    def launch(single_buffer_resident):
        def spec(shape, index_map, constant):
            # Grid-invariant operands are fetched once; single-buffer them.
            if constant and single_buffer_resident:
                return pl.BlockSpec(shape, index_map, pipeline_mode=pl.Buffered(1))
            return pl.BlockSpec(shape, index_map)

        x_spec = spec((bm, c_in), lambda i, k: (i, 0), constant=(grid_m == 1))
        w1_spec = spec((c_in, bk), lambda i, k: (0, k), constant=(nk == 1))
        w2_spec = spec((bk, c_out), lambda i, k: (k, 0), constant=(nk == 1))
        out_spec = pl.BlockSpec((bm, c_out), lambda i, k: (i, 0))

        if has_bias:
            kernel = _mlp_kernel_bias
            in_specs = [
                x_spec,
                w1_spec,
                spec((1, bk), lambda i, k: (0, k), constant=(nk == 1)),
                w2_spec,
                spec((1, c_out), lambda i, k: (0, 0), constant=True),
            ]
            args = (x2, w1, b1, w2, b2)
        else:
            kernel = _mlp_kernel_nobias
            in_specs = [x_spec, w1_spec, w2_spec]
            args = (x2, w1, w2)

        return pl.pallas_call(
            kernel,
            out_shape=jax.ShapeDtypeStruct((rows_p, c_out), x.dtype),
            grid_spec=pltpu.PrefetchScalarGridSpec(
                num_scalar_prefetch=0,
                grid=grid,
                in_specs=in_specs,
                out_specs=out_spec,
                scratch_shapes=[pltpu.VMEM((bm, c_out), jnp.float32)],
            ),
            compiler_params=pltpu.CompilerParams(
                dimension_semantics=("parallel", "arbitrary"),
                vmem_limit_bytes=vmem_limit,
            ),
            cost_estimate=cost,
        )(*args)

    try:
        out = launch(True)
    except Exception:
        # Installed JAX may reject pl.Buffered(1); retry with default buffering.
        out = launch(False)

    if rows_p != rows:
        out = out[:rows]
    return out.reshape(orig_shape[:-1] + (c_out,))


def mlp_forward(x, w_fc, b_fc, w_proj, b_proj, *, dropout_p=0.0, training=False):
    """Convenience wrapper taking torch-layout Linear weights.

    Note: this transposes the weights on every call; for repeated (jitted)
    use, call prepare_mlp_params(...) once and reuse mlp_apply(x, params).
    """
    return mlp_apply(x, prepare_mlp_params(w_fc, b_fc, w_proj, b_proj),
                     dropout_p=dropout_p, training=training)


# ------------------------------- reference ----------------------------------

def _reference_mlp(x, w_fc, b_fc, w_proj, b_proj):
    hp = jax.lax.Precision.HIGHEST
    rows = math.prod(x.shape[:-1])
    x2 = x.reshape(rows, x.shape[-1]).astype(jnp.float32)
    h = jnp.dot(x2, w_fc.astype(jnp.float32).T, precision=hp)
    if b_fc is not None:
        h = h + b_fc.astype(jnp.float32)
    h = jax.nn.gelu(h, approximate=False)   # exact erf GELU == torch nn.GELU()
    y = jnp.dot(h, w_proj.astype(jnp.float32).T, precision=hp)
    if b_proj is not None:
        y = y + b_proj.astype(jnp.float32)
    return y.reshape(x.shape[:-1] + (w_proj.shape[0],)).astype(x.dtype)


if __name__ == "__main__":
    key = jax.random.PRNGKey(0)

    # --- case 1: bias=True, small nanoGPT-ish shapes -------------------------
    batch, seq, n_embd = 2, 8, 32
    n_hidden = 4 * n_embd
    kx, kw1, kw2 = jax.random.split(key, 3)
    x = jax.random.normal(kx, (batch, seq, n_embd), dtype=jnp.float32)
    # torch Linear layout: (out_features, in_features)
    w_fc = jax.random.normal(kw1, (n_hidden, n_embd), dtype=jnp.float32) * (
        1.0 / math.sqrt(n_embd))
    b_fc = 0.01 * jnp.arange(n_hidden, dtype=jnp.float32)
    w_proj = jax.random.normal(kw2, (n_embd, n_hidden), dtype=jnp.float32) * (
        1.0 / math.sqrt(n_hidden))
    b_proj = 0.005 * jnp.arange(n_embd, dtype=jnp.float32)

    params = prepare_mlp_params(w_fc, b_fc, w_proj, b_proj)   # one-time transpose
    out = jax.block_until_ready(mlp_apply(x, params, dropout_p=0.0))
    ref = _reference_mlp(x, w_fc, b_fc, w_proj, b_proj)
    assert out.shape == x.shape
    assert jnp.allclose(out, ref, atol=1e-3, rtol=1e-3), "bias=True mismatch"

    # --- case 2: bias=False (config.bias=False), convenience wrapper ---------
    out_nb = jax.block_until_ready(mlp_forward(x, w_fc, None, w_proj, None))
    ref_nb = _reference_mlp(x, w_fc, None, w_proj, None)
    assert jnp.allclose(out_nb, ref_nb, atol=1e-3, rtol=1e-3), "bias=False mismatch"

    # --- case 3: exercise row padding + hidden-dim accumulation (nk>1) -------
    batch2, seq2, n_embd2 = 2, 20, 64            # rows=40 (padded), c_hid=256
    n_hidden2 = 4 * n_embd2
    kx2, kw3, kw4 = jax.random.split(jax.random.PRNGKey(1), 3)
    x_b = jax.random.normal(kx2, (batch2, seq2, n_embd2), dtype=jnp.float32)
    w_fc2 = jax.random.normal(kw3, (n_hidden2, n_embd2), dtype=jnp.float32) * (
        1.0 / math.sqrt(n_embd2))
    b_fc2 = 0.01 * jnp.arange(n_hidden2, dtype=jnp.float32)
    w_proj2 = jax.random.normal(kw4, (n_embd2, n_hidden2), dtype=jnp.float32) * (
        1.0 / math.sqrt(n_hidden2))
    b_proj2 = 0.005 * jnp.arange(n_embd2, dtype=jnp.float32)
    params2 = prepare_mlp_params(w_fc2, b_fc2, w_proj2, b_proj2)
    out2 = jax.block_until_ready(mlp_apply(x_b, params2, block_m=16, block_k=128))
    ref2 = _reference_mlp(x_b, w_fc2, b_fc2, w_proj2, b_proj2)
    assert jnp.allclose(out2, ref2, atol=1e-3, rtol=1e-3), "tiled (bm/bk) mismatch"

    print("KERNEL_OK")
</pallas_src>

<mosaic_0001>
module attributes {stable_mosaic.version = 11 : i64} {
  func.func @_mlp_kernel_bias(%arg0: i32, %arg1: i32, %arg2: memref<16x32xf32, #tpu.memory_space<vmem>>, %arg3: memref<32x128xf32, #tpu.memory_space<vmem>>, %arg4: memref<1x128xf32, #tpu.memory_space<vmem>>, %arg5: memref<128x32xf32, #tpu.memory_space<vmem>>, %arg6: memref<1x32xf32, #tpu.memory_space<vmem>>, %arg7: memref<16x32xf32, #tpu.memory_space<vmem>>, %arg8: memref<16x32xf32, #tpu.memory_space<vmem>>) attributes {dimension_semantics = [#tpu.dimension_semantics<parallel>, #tpu.dimension_semantics<arbitrary>], iteration_bounds = array<i64: 1, 1>, scalar_prefetch = 0 : i64, scratch_operands = 1 : i64, tpu.core_type = #tpu.core_type<tc>, window_params = [{pipeline_mode = #tpu.pipeline_mode<synchronous>, transform_indices = @transform_0, window_bounds = array<i64: 16, 32>}, {pipeline_mode = #tpu.pipeline_mode<synchronous>, transform_indices = @transform_1, window_bounds = array<i64: 32, 128>}, {pipeline_mode = #tpu.pipeline_mode<synchronous>, transform_indices = @transform_2, window_bounds = array<i64: 1, 128>}, {pipeline_mode = #tpu.pipeline_mode<synchronous>, transform_indices = @transform_3, window_bounds = array<i64: 128, 32>}, {pipeline_mode = #tpu.pipeline_mode<synchronous>, transform_indices = @transform_4, window_bounds = array<i64: 1, 32>}, {transform_indices = @transform_5, window_bounds = array<i64: 16, 32>}]} {
    %c0_i32 = arith.constant 0 : i32
    %0 = arith.cmpi eq, %arg1, %c0_i32 : i32
    %1 = arith.extui %0 : i1 to i32
    %c0_i32_0 = arith.constant 0 : i32
    %2 = arith.cmpi ne, %1, %c0_i32_0 : i32
    scf.if %2 {
      %cst_30 = arith.constant 0.000000e+00 : f32
      %60 = vector.broadcast %cst_30 : f32 to vector<16x32xf32>
      %c0_31 = arith.constant 0 : index
      %c0_32 = arith.constant 0 : index
      %61 = vector.load %arg8[%c0_31, %c0_32] : memref<16x32xf32, #tpu.memory_space<vmem>>, vector<16x32xf32>
      tpu.vector_store %arg8[%c0_31, %c0_32], %60 {strides = array<i32>} : memref<16x32xf32, #tpu.memory_space<vmem>>, vector<16x32xf32>,
    } else {
    }
    %c0 = arith.constant 0 : index
    %c0_1 = arith.constant 0 : index
    %3 = vector.load %arg2[%c0, %c0_1] : memref<16x32xf32, #tpu.memory_space<vmem>>, vector<16x32xf32>
    %c0_2 = arith.constant 0 : index
    %c0_3 = arith.constant 0 : index
    %4 = vector.load %arg3[%c0_2, %c0_3] : memref<32x128xf32, #tpu.memory_space<vmem>>, vector<32x128xf32>
    %cst = arith.constant dense<0.000000e+00> : vector<16x128xf32>
    %5 = tpu.matmul %3, %4, %cst {dimension_numbers = #tpu.dot_dimension_numbers<[1], [0], [0], [1], [0, 0, 1, 1], [], []>} : vector<16x32xf32>, vector<32x128xf32>, vector<16x128xf32> -> vector<16x128xf32>
    %c0_4 = arith.constant 0 : index
    %c0_5 = arith.constant 0 : index
    %6 = vector.load %arg4[%c0_4, %c0_5] : memref<1x128xf32, #tpu.memory_space<vmem>>, vector<1x128xf32>
    %7 = vector.broadcast %6 : vector<1x128xf32> to vector<16x128xf32>
    %8 = arith.addf %5, %7 : vector<16x128xf32>
    %cst_6 = arith.constant 5.000000e-01 : f32
    %9 = vector.broadcast %cst_6 : f32 to vector<16x128xf32>
    %10 = arith.mulf %9, %8 : vector<16x128xf32>
    %cst_7 = arith.constant 0.707106769 : f32
    %11 = vector.broadcast %cst_7 : f32 to vector<16x128xf32>
    %12 = arith.mulf %8, %11 : vector<16x128xf32>
    %13 = math.absf %12 : vector<16x128xf32>
    %cst_8 = arith.constant 0.327591091 : f32
    %14 = vector.broadcast %cst_8 : f32 to vector<16x128xf32>
    %15 = arith.mulf %14, %13 : vector<16x128xf32>
    %cst_9 = arith.constant 1.000000e+00 : f32
    %16 = vector.broadcast %cst_9 : f32 to vector<16x128xf32>
    %17 = arith.addf %16, %15 : vector<16x128xf32>
    %18 = tpu.reciprocal %17 {approx = true} : vector<16x128xf32> -> vector<16x128xf32>
    %19 = arith.mulf %17, %18 : vector<16x128xf32>
    %cst_10 = arith.constant 2.000000e+00 : f32
    %20 = vector.broadcast %cst_10 : f32 to vector<16x128xf32>
    %21 = arith.subf %20, %19 : vector<16x128xf32>
    %22 = arith.mulf %18, %21 : vector<16x128xf32>
    %cst_11 = arith.constant 1.06140542 : f32
    %23 = vector.broadcast %cst_11 : f32 to vector<16x128xf32>
    %24 = arith.mulf %22, %23 : vector<16x128xf32>
    %cst_12 = arith.constant -1.45315206 : f32
    %25 = vector.broadcast %cst_12 : f32 to vector<16x128xf32>
    %26 = arith.addf %25, %24 : vector<16x128xf32>
    %27 = arith.mulf %22, %26 : vector<16x128xf32>
    %cst_13 = arith.constant 1.42141378 : f32
    %28 = vector.broadcast %cst_13 : f32 to vector<16x128xf32>
    %29 = arith.addf %28, %27 : vector<16x128xf32>
    %30 = arith.mulf %22, %29 : vector<16x128xf32>
    %cst_14 = arith.constant -0.284496725 : f32
    %31 = vector.broadcast %cst_14 : f32 to vector<16x128xf32>
    %32 = arith.addf %31, %30 : vector<16x128xf32>
    %33 = arith.mulf %22, %32 : vector<16x128xf32>
    %cst_15 = arith.constant 0.254829586 : f32
    %34 = vector.broadcast %cst_15 : f32 to vector<16x128xf32>
    %35 = arith.addf %34, %33 : vector<16x128xf32>
    %36 = arith.mulf %22, %35 : vector<16x128xf32>
    %cst_16 = arith.constant 0.000000e+00 : f32
    %37 = vector.broadcast %cst_16 : f32 to vector<16x128xf32>
    %38 = arith.subf %37, %13 : vector<16x128xf32>
    %39 = arith.mulf %38, %13 : vector<16x128xf32>
    %40 = math.exp %39 : vector<16x128xf32>
    %41 = arith.mulf %36, %40 : vector<16x128xf32>
    %cst_17 = arith.constant 1.000000e+00 : f32
    %42 = vector.broadcast %cst_17 : f32 to vector<16x128xf32>
    %43 = arith.subf %42, %41 : vector<16x128xf32>
    %cst_18 = arith.constant 0.000000e+00 : f32
    %44 = vector.broadcast %cst_18 : f32 to vector<16x128xf32>
    %45 = arith.cmpf olt, %12, %44 : vector<16x128xf32>
    %cst_19 = arith.constant 0.000000e+00 : f32
    %46 = vector.broadcast %cst_19 : f32 to vector<16x128xf32>
    %47 = arith.subf %46, %43 : vector<16x128xf32>
    %48 = arith.select %45, %47, %43 : vector<16x128xi1>, vector<16x128xf32>
    %cst_20 = arith.constant 1.000000e+00 : f32
    %49 = vector.broadcast %cst_20 : f32 to vector<16x128xf32>
    %50 = arith.addf %49, %48 : vector<16x128xf32>
    %51 = arith.mulf %10, %50 : vector<16x128xf32>
    %c0_21 = arith.constant 0 : index
    %c0_22 = arith.constant 0 : index
    %52 = vector.load %arg8[%c0_21, %c0_22] : memref<16x32xf32, #tpu.memory_space<vmem>>, vector<16x32xf32>
    %c0_23 = arith.constant 0 : index
    %c0_24 = arith.constant 0 : index
    %53 = vector.load %arg5[%c0_23, %c0_24] : memref<128x32xf32, #tpu.memory_space<vmem>>, vector<128x32xf32>
    %cst_25 = arith.constant dense<0.000000e+00> : vector<16x32xf32>
    %54 = tpu.matmul %51, %53, %cst_25 {dimension_numbers = #tpu.dot_dimension_numbers<[1], [0], [0], [1], [0, 0, 1, 1], [], []>} : vector<16x128xf32>, vector<128x32xf32>, vector<16x32xf32> -> vector<16x32xf32>
    %55 = arith.addf %52, %54 : vector<16x32xf32>
    %c0_26 = arith.constant 0 : index
    %c0_27 = arith.constant 0 : index
    %56 = vector.load %arg8[%c0_26, %c0_27] : memref<16x32xf32, #tpu.memory_space<vmem>>, vector<16x32xf32>
    tpu.vector_store %arg8[%c0_26, %c0_27], %55 {strides = array<i32>} : memref<16x32xf32, #tpu.memory_space<vmem>>, vector<16x32xf32>,
    %c0_i32_28 = arith.constant 0 : i32
    %57 = arith.cmpi eq, %arg1, %c0_i32_28 : i32
    %58 = arith.extui %57 : i1 to i32
    %c0_i32_29 = arith.constant 0 : i32
    %59 = arith.cmpi ne, %58, %c0_i32_29 : i32
    scf.if %59 {
      %c0_30 = arith.constant 0 : index
      %c0_31 = arith.constant 0 : index
      %60 = vector.load %arg8[%c0_30, %c0_31] : memref<16x32xf32, #tpu.memory_space<vmem>>, vector<16x32xf32>
      %c0_32 = arith.constant 0 : index
      %c0_33 = arith.constant 0 : index
      %61 = vector.load %arg6[%c0_32, %c0_33] : memref<1x32xf32, #tpu.memory_space<vmem>>, vector<1x32xf32>
      %62 = vector.broadcast %61 : vector<1x32xf32> to vector<16x32xf32>
      %63 = arith.addf %60, %62 : vector<16x32xf32>
      %c0_34 = arith.constant 0 : index
      %c0_35 = arith.constant 0 : index
      %64 = vector.load %arg7[%c0_34, %c0_35] : memref<16x32xf32, #tpu.memory_space<vmem>>, vector<16x32xf32>
      tpu.vector_store %arg7[%c0_34, %c0_35], %63 {strides = array<i32>} : memref<16x32xf32, #tpu.memory_space<vmem>>, vector<16x32xf32>,
    } else {
    }
    return
  }
  func.func @transform_0(%arg0: i32, %arg1: i32) -> (i32, i32) {
    %c0_i32 = arith.constant 0 : i32
    %c0_i32_0 = arith.constant 0 : i32
    return %arg0, %c0_i32 : i32, i32
  }
  func.func @transform_1(%arg0: i32, %arg1: i32) -> (i32, i32) {
    %c0_i32 = arith.constant 0 : i32
    %c0_i32_0 = arith.constant 0 : i32
    return %c0_i32, %arg1 : i32, i32
  }
  func.func @transform_2(%arg0: i32, %arg1: i32) -> (i32, i32) {
    %c0_i32 = arith.constant 0 : i32
    %c0_i32_0 = arith.constant 0 : i32
    return %c0_i32, %arg1 : i32, i32
  }
  func.func @transform_3(%arg0: i32, %arg1: i32) -> (i32, i32) {
    %c0_i32 = arith.constant 0 : i32
    %c0_i32_0 = arith.constant 0 : i32
    return %arg1, %c0_i32 : i32, i32
  }
  func.func @transform_4(%arg0: i32, %arg1: i32) -> (i32, i32) {
    %c0_i32 = arith.constant 0 : i32
    %c0_i32_0 = arith.constant 0 : i32
    %c0_i32_1 = arith.constant 0 : i32
    return %c0_i32, %c0_i32_0 : i32, i32
  }
  func.func @transform_5(%arg0: i32, %arg1: i32) -> (i32, i32) {
    %c0_i32 = arith.constant 0 : i32
    %c0_i32_0 = arith.constant 0 : i32
    return %arg0, %c0_i32 : i32, i32
  }
}

module attributes {stable_mosaic.version = 11 : i64} {
  func.func @_mlp_kernel_bias(%arg0: i32, %arg1: i32, %arg2: memref<16x32xf32, #tpu.memory_space<vmem>>, %arg3: memref<32x128xf32, #tpu.memory_space<vmem>>, %arg4: memref<1x128xf32, #tpu.memory_space<vmem>>, %arg5: memref<128x32xf32, #tpu.memory_space<vmem>>, %arg6: memref<1x32xf32, #tpu.memory_space<vmem>>, %arg7: memref<16x32xf32, #tpu.memory_space<vmem>>, %arg8: memref<16x32xf32, #tpu.memory_space<vmem>>) attributes {dimension_semantics = [#tpu.dimension_semantics<parallel>, #tpu.dimension_semantics<arbitrary>], iteration_bounds = array<i64: 1, 1>, scalar_prefetch = 0 : i64, scratch_operands = 1 : i64, tpu.core_type = #tpu.core_type<tc>, window_params = [{transform_indices = @transform_0, window_bounds = array<i64: 16, 32>}, {transform_indices = @transform_1, window_bounds = array<i64: 32, 128>}, {transform_indices = @transform_2, window_bounds = array<i64: 1, 128>}, {transform_indices = @transform_3, window_bounds = array<i64: 128, 32>}, {pipeline_mode = #tpu.pipeline_mode<synchronous>, transform_indices = @transform_4, window_bounds = array<i64: 1, 32>}, {transform_indices = @transform_5, window_bounds = array<i64: 16, 32>}]} {
    %c0_i32 = arith.constant 0 : i32
    %0 = arith.cmpi eq, %arg1, %c0_i32 : i32
    %1 = arith.extui %0 : i1 to i32
    %c0_i32_0 = arith.constant 0 : i32
    %2 = arith.cmpi ne, %1, %c0_i32_0 : i32
    scf.if %2 {
      %cst_30 = arith.constant 0.000000e+00 : f32
      %60 = vector.broadcast %cst_30 : f32 to vector<16x32xf32>
      %c0_31 = arith.constant 0 : index
      %c0_32 = arith.constant 0 : index
      %61 = vector.load %arg8[%c0_31, %c0_32] : memref<16x32xf32, #tpu.memory_space<vmem>>, vector<16x32xf32>
      tpu.vector_store %arg8[%c0_31, %c0_32], %60 {strides = array<i32>} : memref<16x32xf32, #tpu.memory_space<vmem>>, vector<16x32xf32>,
    } else {
    }
    %c0 = arith.constant 0 : index
    %c0_1 = arith.constant 0 : index
    %3 = vector.load %arg2[%c0, %c0_1] : memref<16x32xf32, #tpu.memory_space<vmem>>, vector<16x32xf32>
    %c0_2 = arith.constant 0 : index
    %c0_3 = arith.constant 0 : index
    %4 = vector.load %arg3[%c0_2, %c0_3] : memref<32x128xf32, #tpu.memory_space<vmem>>, vector<32x128xf32>
    %cst = arith.constant dense<0.000000e+00> : vector<16x128xf32>
    %5 = tpu.matmul %3, %4, %cst {dimension_numbers = #tpu.dot_dimension_numbers<[1], [0], [0], [1], [0, 0, 1, 1], [], []>} : vector<16x32xf32>, vector<32x128xf32>, vector<16x128xf32> -> vector<16x128xf32>
    %c0_4 = arith.constant 0 : index
    %c0_5 = arith.constant 0 : index
    %6 = vector.load %arg4[%c0_4, %c0_5] : memref<1x128xf32, #tpu.memory_space<vmem>>, vector<1x128xf32>
    %7 = vector.broadcast %6 : vector<1x128xf32> to vector<16x128xf32>
    %8 = arith.addf %5, %7 : vector<16x128xf32>
    %cst_6 = arith.constant 5.000000e-01 : f32
    %9 = vector.broadcast %cst_6 : f32 to vector<16x128xf32>
    %10 = arith.mulf %9, %8 : vector<16x128xf32>
    %cst_7 = arith.constant 0.707106769 : f32
    %11 = vector.broadcast %cst_7 : f32 to vector<16x128xf32>
    %12 = arith.mulf %8, %11 : vector<16x128xf32>
    %13 = math.absf %12 : vector<16x128xf32>
    %cst_8 = arith.constant 0.327591091 : f32
    %14 = vector.broadcast %cst_8 : f32 to vector<16x128xf32>
    %15 = arith.mulf %14, %13 : vector<16x128xf32>
    %cst_9 = arith.constant 1.000000e+00 : f32
    %16 = vector.broadcast %cst_9 : f32 to vector<16x128xf32>
    %17 = arith.addf %16, %15 : vector<16x128xf32>
    %18 = tpu.reciprocal %17 {approx = true} : vector<16x128xf32> -> vector<16x128xf32>
    %19 = arith.mulf %17, %18 : vector<16x128xf32>
    %cst_10 = arith.constant 2.000000e+00 : f32
    %20 = vector.broadcast %cst_10 : f32 to vector<16x128xf32>
    %21 = arith.subf %20, %19 : vector<16x128xf32>
    %22 = arith.mulf %18, %21 : vector<16x128xf32>
    %cst_11 = arith.constant 1.06140542 : f32
    %23 = vector.broadcast %cst_11 : f32 to vector<16x128xf32>
    %24 = arith.mulf %22, %23 : vector<16x128xf32>
    %cst_12 = arith.constant -1.45315206 : f32
    %25 = vector.broadcast %cst_12 : f32 to vector<16x128xf32>
    %26 = arith.addf %25, %24 : vector<16x128xf32>
    %27 = arith.mulf %22, %26 : vector<16x128xf32>
    %cst_13 = arith.constant 1.42141378 : f32
    %28 = vector.broadcast %cst_13 : f32 to vector<16x128xf32>
    %29 = arith.addf %28, %27 : vector<16x128xf32>
    %30 = arith.mulf %22, %29 : vector<16x128xf32>
    %cst_14 = arith.constant -0.284496725 : f32
    %31 = vector.broadcast %cst_14 : f32 to vector<16x128xf32>
    %32 = arith.addf %31, %30 : vector<16x128xf32>
    %33 = arith.mulf %22, %32 : vector<16x128xf32>
    %cst_15 = arith.constant 0.254829586 : f32
    %34 = vector.broadcast %cst_15 : f32 to vector<16x128xf32>
    %35 = arith.addf %34, %33 : vector<16x128xf32>
    %36 = arith.mulf %22, %35 : vector<16x128xf32>
    %cst_16 = arith.constant 0.000000e+00 : f32
    %37 = vector.broadcast %cst_16 : f32 to vector<16x128xf32>
    %38 = arith.subf %37, %13 : vector<16x128xf32>
    %39 = arith.mulf %38, %13 : vector<16x128xf32>
    %40 = math.exp %39 : vector<16x128xf32>
    %41 = arith.mulf %36, %40 : vector<16x128xf32>
    %cst_17 = arith.constant 1.000000e+00 : f32
    %42 = vector.broadcast %cst_17 : f32 to vector<16x128xf32>
    %43 = arith.subf %42, %41 : vector<16x128xf32>
    %cst_18 = arith.constant 0.000000e+00 : f32
    %44 = vector.broadcast %cst_18 : f32 to vector<16x128xf32>
    %45 = arith.cmpf olt, %12, %44 : vector<16x128xf32>
    %cst_19 = arith.constant 0.000000e+00 : f32
    %46 = vector.broadcast %cst_19 : f32 to vector<16x128xf32>
    %47 = arith.subf %46, %43 : vector<16x128xf32>
    %48 = arith.select %45, %47, %43 : vector<16x128xi1>, vector<16x128xf32>
    %cst_20 = arith.constant 1.000000e+00 : f32
    %49 = vector.broadcast %cst_20 : f32 to vector<16x128xf32>
    %50 = arith.addf %49, %48 : vector<16x128xf32>
    %51 = arith.mulf %10, %50 : vector<16x128xf32>
    %c0_21 = arith.constant 0 : index
    %c0_22 = arith.constant 0 : index
    %52 = vector.load %arg8[%c0_21, %c0_22] : memref<16x32xf32, #tpu.memory_space<vmem>>, vector<16x32xf32>
    %c0_23 = arith.constant 0 : index
    %c0_24 = arith.constant 0 : index
    %53 = vector.load %arg5[%c0_23, %c0_24] : memref<128x32xf32, #tpu.memory_space<vmem>>, vector<128x32xf32>
    %cst_25 = arith.constant dense<0.000000e+00> : vector<16x32xf32>
    %54 = tpu.matmul %51, %53, %cst_25 {dimension_numbers = #tpu.dot_dimension_numbers<[1], [0], [0], [1], [0, 0, 1, 1], [], []>} : vector<16x128xf32>, vector<128x32xf32>, vector<16x32xf32> -> vector<16x32xf32>
    %55 = arith.addf %52, %54 : vector<16x32xf32>
    %c0_26 = arith.constant 0 : index
    %c0_27 = arith.constant 0 : index
    %56 = vector.load %arg8[%c0_26, %c0_27] : memref<16x32xf32, #tpu.memory_space<vmem>>, vector<16x32xf32>
    tpu.vector_store %arg8[%c0_26, %c0_27], %55 {strides = array<i32>} : memref<16x32xf32, #tpu.memory_space<vmem>>, vector<16x32xf32>,
    %c0_i32_28 = arith.constant 0 : i32
    %57 = arith.cmpi eq, %arg1, %c0_i32_28 : i32
    %58 = arith.extui %57 : i1 to i32
    %c0_i32_29 = arith.constant 0 : i32
    %59 = arith.cmpi ne, %58, %c0_i32_29 : i32
    scf.if %59 {
      %c0_30 = arith.constant 0 : index
      %c0_31 = arith.constant 0 : index
      %60 = vector.load %arg8[%c0_30, %c0_31] : memref<16x32xf32, #tpu.memory_space<vmem>>, vector<16x32xf32>
      %c0_32 = arith.constant 0 : index
      %c0_33 = arith.constant 0 : index
      %61 = vector.load %arg6[%c0_32, %c0_33] : memref<1x32xf32, #tpu.memory_space<vmem>>, vector<1x32xf32>
      %62 = vector.broadcast %61 : vector<1x32xf32> to vector<16x32xf32>
      %63 = arith.addf %60, %62 : vector<16x32xf32>
      %c0_34 = arith.constant 0 : index
      %c0_35 = arith.constant 0 : index
      %64 = vector.load %arg7[%c0_34, %c0_35] : memref<16x32xf32, #tpu.memory_space<vmem>>, vector<16x32xf32>
      tpu.vector_store %arg7[%c0_34, %c0_35], %63 {strides = array<i32>} : memref<16x32xf32, #tpu.memory_space<vmem>>, vector<16x32xf32>,
    } else {
    }
    return
  }
  func.func @transform_0(%arg0: i32, %arg1: i32) -> (i32, i32) {
    %c0_i32 = arith.constant 0 : i32
    %c0_i32_0 = arith.constant 0 : i32
    return %arg0, %c0_i32 : i32, i32
  }
  func.func @transform_1(%arg0: i32, %arg1: i32) -> (i32, i32) {
    %c0_i32 = arith.constant 0 : i32
    %c0_i32_0 = arith.constant 0 : i32
    return %c0_i32, %arg1 : i32, i32
  }
  func.func @transform_2(%arg0: i32, %arg1: i32) -> (i32, i32) {
    %c0_i32 = arith.constant 0 : i32
    %c0_i32_0 = arith.constant 0 : i32
    return %c0_i32, %arg1 : i32, i32
  }
  func.func @transform_3(%arg0: i32, %arg1: i32) -> (i32, i32) {
    %c0_i32 = arith.constant 0 : i32
    %c0_i32_0 = arith.constant 0 : i32
    return %arg1, %c0_i32 : i32, i32
  }
  func.func @transform_4(%arg0: i32, %arg1: i32) -> (i32, i32) {
    %c0_i32 = arith.constant 0 : i32
    %c0_i32_0 = arith.constant 0 : i32
    %c0_i32_1 = arith.constant 0 : i32
    return %c0_i32, %c0_i32_0 : i32, i32
  }
  func.func @transform_5(%arg0: i32, %arg1: i32) -> (i32, i32) {
    %c0_i32 = arith.constant 0 : i32
    %c0_i32_0 = arith.constant 0 : i32
    return %arg0, %c0_i32 : i32, i32
  }
}

</mosaic_0001>

<bundles_post_ra>
// kernel: tpu_custom_call.1
= control target key start
LH: loop header
LB: loop body
LE: loop exit
PB: predicated region body
PF: predicated region fallthrough
CT: control target
= control target key end

     0   :  { %vm25_vm0 = vcmask 261120   ;;  %s535_s0 = inlined_call_operand.vmem [shape: f32[16,32], index: 0, kind: input, shape index: {}]   ;;  %s536_s1 = inlined_call_operand.vmem [shape: f32[32,128], index: 1, kind: input, shape index: {}]   ;;  %s537_s2 = inlined_call_operand.vmem [shape: f32[1,128], index: 2, kind: input, shape index: {}]   ;;  %s538_s3 = inlined_call_operand.vmem [shape: f32[128,32], index: 3, kind: input, shape index: {}]   ;;  %s539_s4 = inlined_call_operand.vmem [shape: f32[1,32], index: 4, kind: input, shape index: {}]   ;;  %s540_s5 = inlined_call_operand.hbm [shape: f32[16,32], index: 5, kind: output, shape index: {}]  }
   0x1   :  { %v33_v0 = vld [vmem:[%s536_s1 + $0x18] sm:$0xff]  ;;  %v32_v1 = vld [vmem:[%s536_s1 + $0x10] sm:$0xff]  ;;  %v28_v2 = vld [vmem:[%s535_s0] sm:$0xff] }
   0x2   :  { %338 = vmatprep.subr.mxu0 %v33_v0  ;;  %v31_v3 = vld [vmem:[%s536_s1 + $0x8] sm:$0xff]  ;;  %346 = vmatprep.mubr.msk.f32.mxu0 %vm25_vm0, %v28_v2 }
   0x3   :  { %339 = vmatpush3.msra.mxu0 %v33_v0 }
   0x4   :  { %10 = vsyncpa [#allocation4], 0  ;;  %340 = vmatprep.subr.mxu0 %v32_v1  ;;  %v30_v4 = vld [vmem:[%s536_s1] sm:$0xff]  ;;  %v29_v5 = vld [vmem:[%s535_s0 + $0x8] sm:$0xff]  ;;  %v418_v22 = vmov 0.0   ;;  %s419_s10 = smov [#allocation3]  }
   0x5   :  { %341 = vmatpush3.msra.mxu0 %v32_v1  ;;  %v198_v6 = vld [vmem:[%s538_s3 + $0x78] sm:$0xff]  ;;  %v197_v7 = vld [vmem:[%s538_s3 + $0x70] sm:$0xff]  ;;  %v196_v8 = vld [vmem:[%s538_s3 + $0x68] sm:$0xff]  ;;  %27 = vst.msk [vmem:[#allocation2 + $0x8] sm:$0xff] %vm25_vm0, %v418_v22  ;;  %s299_s11 = sshll.u32 %s419_s10, 4  ;;  %s300_s11 = int_to_ptr.vmem [resolvable:$true] %s299_s11 }
   0x6   :  { %342 = vmatprep.subr.mxu0 %v31_v3  ;;  %349 = vmatprep.subr.mxu1 %v198_v6  ;;  %v195_v9 = vld [vmem:[%s538_s3 + $0x60] sm:$0xff]  ;;  %v194_v10 = vld [vmem:[%s538_s3 + $0x58] sm:$0xff]  ;;  %v193_v11 = vld [vmem:[%s538_s3 + $0x50] sm:$0xff]  ;;  %26 = vst.msk [vmem:[#allocation2] sm:$0xff] %vm25_vm0, %v418_v22  ;;  %s396_s12 = scalar_lea.vmem %s300_s11, 256  ;;  %p401_p1 = scmp.lt.s32.totalorder %s300_s11, %s300_s11 }
   0x7   :  { %343 = vmatpush3.msra.mxu0 %v31_v3  ;;  %350 = vmatpush3.msra.mxu1 %v198_v6  ;;  %v192_v12 = vld [vmem:[%s538_s3 + $0x48] sm:$0xff]  ;;  %v191_v13 = vld [vmem:[%s538_s3 + $0x40] sm:$0xff]  ;;  %v190_v14 = vld [vmem:[%s538_s3 + $0x38] sm:$0xff]  ;;  %p397_p0 = scmp.ne.s32.totalorder %s300_s11, %s396_s12  ;;  %p402_p2 = scmp.lt.s32.totalorder %s396_s12, %s396_s12 }
   0x8   :  { %344 = vmatprep.subr.mxu0 %v30_v4  ;;  %351 = vmatprep.subr.mxu1 %v197_v7  ;;  %v189_v15 = vld [vmem:[%s538_s3 + $0x30] sm:$0xff]  ;;  %v188_v16 = vld [vmem:[%s538_s3 + $0x28] sm:$0xff]  ;;  %v187_v17 = vld [vmem:[%s538_s3 + $0x20] sm:$0xff] }
   0x9   :  { %345 = vmatpush3.msra.mxu0 %v30_v4  ;;  %352 = vmatpush3.msra.mxu1 %v197_v7  ;;  %v186_v18 = vld [vmem:[%s538_s3 + $0x18] sm:$0xff]  ;;  %v185_v19 = vld [vmem:[%s538_s3 + $0x10] sm:$0xff]  ;;  %v184_v20 = vld [vmem:[%s538_s3 + $0x8] sm:$0xff]  ;;  %p403_p3 = por %p402_p2, %p401_p1 }
   0xa   :  { %347 = vmatmul.mubr.msk.f32.vlgmr.msra.gmra.mxu0 %vm25_vm0, %v29_v5  ;;  %353 = vmatprep.subr.mxu1 %v196_v8  ;;  %v183_v21 = vld [vmem:[%s538_s3] sm:$0xff] }
   0xb   :  { %354 = vmatpush3.msra.mxu1 %v196_v8  ;;  %v310_v23 = vld [vmem:[%s537_s2] ss:$0 sm:$0xff]  ;;  %p404_p4 = pnand %p403_p3, %p397_p0 }
   0xc   :  { %355 = vmatprep.subr.mxu1 %v195_v9 }
   0xd   :  { %356 = vmatpush3.msra.mxu1 %v195_v9  ;;  %v181_v22 = vld [vmem:[#allocation2] sm:$0xff] }
   0xe   :  { %357 = vmatprep.subr.mxu1 %v194_v10 }
   0xf   :  { %358 = vmatpush3.msra.mxu1 %v194_v10 }
  0x10   :  { %359 = vmatprep.subr.mxu1 %v193_v11 }
  0x11   :  { %360 = vmatpush3.msra.mxu1 %v193_v11 }
  0x12   :  { %361 = vmatprep.subr.mxu1 %v192_v12 }
  0x13   :  { %362 = vmatpush3.msra.mxu1 %v192_v12 }
  0x14   :  { %363 = vmatprep.subr.mxu1 %v191_v13 }
  0x15   :  { %364 = vmatpush3.msra.mxu1 %v191_v13 }
  0x16   :  { %365 = vmatprep.subr.mxu1 %v190_v14 }
  0x17   :  { %366 = vmatpush3.msra.mxu1 %v190_v14 }
  0x18   :  { %367 = vmatprep.subr.mxu1 %v189_v15 }
  0x19   :  { %368 = vmatpush3.msra.mxu1 %v189_v15 }
  0x1a   :  { %369 = vmatprep.subr.mxu1 %v188_v16 }
  0x1b   :  { %370 = vmatpush3.msra.mxu1 %v188_v16 }
  0x1c   :  { %371 = vmatprep.subr.mxu1 %v187_v17 }
  0x1d   :  { %372 = vmatpush3.msra.mxu1 %v187_v17 }
  0x1e   :  { %373 = vmatprep.subr.mxu1 %v186_v18 }
  0x1f   :  { %374 = vmatpush3.msra.mxu1 %v186_v18 }
  0x20   :  { %375 = vmatprep.subr.mxu1 %v185_v19 }
  0x21   :  { %376 = vmatpush3.msra.mxu1 %v185_v19 }
  0x22   :  { %377 = vmatprep.subr.mxu1 %v184_v20 }
  0x23   :  { %378 = vmatpush3.msra.mxu1 %v184_v20  ;;  %v182_v20 = vld [vmem:[#allocation2 + $0x8] sm:$0xff] }
  0x24   :  { %379 = vmatprep.subr.mxu1 %v183_v21 }
  0x25   :  { %380 = vmatpush3.msra.mxu1 %v183_v21 }
  0xca   :  { %v348_v24 = vpop.f32.mrf.mxu0 }
  0xcb   :  { %v120_v25 = vadd.f32 %v348_v24, %v310_v23 }
  0xcc   :  { %v114_v26 = vpop.f32.mrf.mxu0 }
  0xcd   :  { %v126_v27 = vmul.f32 0.70710677, %v120_v25  ;;  %v115_v28 = vadd.f32 %v310_v23, %v114_v26  ;;  %v124_v17 = vmul.f32 0.5, %v120_v25 }
  0xcf   :  { %v128_v29 = vand.u32 2147483647, %v126_v27  ;;  %v125_v30 = vmul.f32 0.70710677, %v115_v28  ;;  %vm172_vm1 = vcmp.lt.f32.partialorder %v126_v27, 0.0  ;;  %v123_v15 = vmul.f32 0.5, %v115_v28 }
  0xd0   :  { %v313_v27 = vld [vmem:[%s539_s4] ss:$0 sm:$0xff] }
  0xd1   :  { %v130_v31 = vmul.f32 0.3275911, %v128_v29  ;;  %v127_v32 = vand.u32 2147483647, %v125_v30  ;;  %v160_v36 = vsub.f32 0.0, %v128_v29  ;;  %vm171_vm2 = vcmp.lt.f32.partialorder %v125_v30, 0.0 }
  0xd3   :  { %v132_v33 = vadd.f32 1.0, %v130_v31  ;;  %v129_v34 = vmul.f32 0.3275911, %v127_v32  ;;  %v159_v39 = vsub.f32 0.0, %v127_v32  ;;  %v162_v42 = vmul.f32 %v160_v36, %v128_v29 }
  0xd5   :  { %388 = vrcp.f32 %v132_v33  ;;  %v131_v35 = vadd.f32 1.0, %v129_v34  ;;  %v161_v46 = vmul.f32 %v159_v39, %v127_v32  ;;  %v165_v47 = vmul.f32 1.442695, %v162_v42 }
  0xd7   :  { %390 = vrcp.f32 %v131_v35  ;;  %v163_v51 = vmul.f32 1.442695, %v161_v46 }
  0xd8   :  { %392 = vpow2.f32 %v165_v47 }
  0xd9   :  { %394 = vpow2.f32 %v163_v51 }
  0xe2   :  { %v389_v37 = vpop.eup %388 }
  0xe3   :  { %v136_v38 = vmul.f32 %v389_v37, %v132_v33 }
  0xe4   :  { %v391_v40 = vpop.eup %390 }
  0xe5   :  { %v138_v41 = vsub.f32 2.0, %v136_v38  ;;  %v135_v43 = vmul.f32 %v391_v40, %v131_v35  ;;  %v393_v2 = vpop.eup %392 }
  0xe6   :  { %v395_v6 = vpop.eup %394 }
  0xe7   :  { %v140_v44 = vmul.f32 %v389_v37, %v138_v41  ;;  %v137_v45 = vsub.f32 2.0, %v135_v43 }
  0xe9   :  { %v142_v48 = vmul.f32 1.0614054, %v140_v44  ;;  %v139_v49 = vmul.f32 %v391_v40, %v137_v45 }
  0xeb   :  { %v144_v50 = vadd.f32 -1.4531521, %v142_v48  ;;  %v141_v52 = vmul.f32 1.0614054, %v139_v49 }
  0xed   :  { %v146_v53 = vmul.f32 %v144_v50, %v140_v44  ;;  %v143_v54 = vadd.f32 -1.4531521, %v141_v52 }
  0xef   :  { %v148_v55 = vadd.f32 1.4214138, %v146_v53  ;;  %v145_v56 = vmul.f32 %v143_v54, %v139_v49 }
  0xf1   :  { %v150_v57 = vmul.f32 %v148_v55, %v140_v44  ;;  %v147_v58 = vadd.f32 1.4214138, %v145_v56 }
  0xf3   :  { %v152_v59 = vadd.f32 -0.28449672, %v150_v57  ;;  %v149_v60 = vmul.f32 %v147_v58, %v139_v49 }
  0xf5   :  { %v154_v61 = vmul.f32 %v152_v59, %v140_v44  ;;  %v151_v62 = vadd.f32 -0.28449672, %v149_v60 }
  0xf7   :  { %v156_v63 = vadd.f32 0.2548296, %v154_v61  ;;  %v153_v0 = vmul.f32 %v151_v62, %v139_v49 }
  0xf9   :  { %v158_v1 = vmul.f32 %v156_v63, %v140_v44  ;;  %v155_v3 = vadd.f32 0.2548296, %v153_v0 }
  0xfb   :  { %v168_v4 = vmul.f32 %v393_v2, %v158_v1  ;;  %v157_v5 = vmul.f32 %v155_v3, %v139_v49 }
  0xfd   :  { %v170_v7 = vsub.f32 1.0, %v168_v4  ;;  %v167_v8 = vmul.f32 %v395_v6, %v157_v5 }
  0xff   :  { %v174_v9 = vsub.f32 0.0, %v170_v7  ;;  %v169_v10 = vsub.f32 1.0, %v167_v8 }
 0x101   :  { %v176_v11 = vsel %vm172_vm1, %v174_v9, %v170_v7  ;;  %v173_v12 = vsub.f32 0.0, %v169_v10 }
 0x102   :  { %v178_v14 = vadd.f32 1.0, %v176_v11 }
 0x103   :  { %v175_v13 = vsel %vm171_vm2, %v173_v12, %v169_v10 }
 0x104   :  { %v177_v16 = vadd.f32 1.0, %v175_v13  ;;  %v180_v19 = vmul.f32 %v178_v14, %v124_v17 }
 0x106   :  { %v179_v18 = vmul.f32 %v177_v16, %v123_v15 }
 0x108   :  { %381 = vmatprep.mubr.f32.mxu1 %v179_v18 }
 0x109   :  { %382 = vmatmul.mubr.f32.vlgmr.msra.gmra.mxu1 %v180_v19 }
 0x1c9   :  { %v383_v21 = vpop.f32.mrf.mxu1 }
 0x1ca   :  { %v275_v23 = vadd.f32 %v383_v21, %v182_v20 }
 0x1cb   :  { %v265_v24 = vpop.f32.mrf.mxu1 }
 0x1cc   :  { %277 = vst.msk [vmem:[#allocation2 + $0x8] sm:$0xff] %vm25_vm0, %v275_v23  ;;  %v274_v26 = vadd.f32 %v265_v24, %v181_v22 }
 0x1ce   :  { %276 = vst.msk [vmem:[#allocation2] sm:$0xff] %vm25_vm0, %v274_v26 }
 0x1d3   :  { %v282_v25 = vld [vmem:[#allocation2 + $0x8] sm:$0xff] }
 0x1d4   :  { %v291_v28 = vadd.f32 %v313_v27, %v282_v25 }
 0x1d5   :  { %v281_v29 = vld [vmem:[#allocation2] sm:$0xff] }
 0x1d6   :  { %v290_v30 = vadd.f32 %v313_v27, %v281_v29  ;;  %293 = vst.msk [vmem:[#allocation3 + $0x8] sm:$0xff] %vm25_vm0, %v291_v28 }
 0x1d8   :  { %292 = vst.msk [vmem:[#allocation3] sm:$0xff] %vm25_vm0, %v290_v30 }
 0x1d9   :  { %407 = shalt.err (!%p404_p4)
}
 0x1da   :  { %s420_s13 = smov 128   ;;  %s421_s4 = smov 8  }
 0x1db   :  { %305 = dma.vmem_to_hbm [thread:$0]  %s300_s11, 256, %s540_s5, [#allocation4], %s420_s13, %s420_s13, %s421_s4  }
 0x1dc   :  { %416 = dma.done.wait [#allocation4], 256  }
 0x1dd   :  { %417 = vsyncadd [#allocation4], 4294967040 }
 0x1de   :  { %309 = vsyncpa [#allocation4], 1 }

// kernel: tpu_custom_call.1
= control target key start
LH: loop header
LB: loop body
LE: loop exit
PB: predicated region body
PF: predicated region fallthrough
CT: control target
= control target key end

     0   :  { %vm25_vm0 = vcmask 261120   ;;  %s535_s0 = inlined_call_operand.vmem [shape: f32[16,32], index: 0, kind: input, shape index: {}]   ;;  %s536_s1 = inlined_call_operand.vmem [shape: f32[32,128], index: 1, kind: input, shape index: {}]   ;;  %s537_s2 = inlined_call_operand.vmem [shape: f32[1,128], index: 2, kind: input, shape index: {}]   ;;  %s538_s3 = inlined_call_operand.vmem [shape: f32[128,32], index: 3, kind: input, shape index: {}]   ;;  %s539_s4 = inlined_call_operand.vmem [shape: f32[1,32], index: 4, kind: input, shape index: {}]   ;;  %s540_s5 = inlined_call_operand.hbm [shape: f32[16,32], index: 5, kind: output, shape index: {}]  }
   0x1   :  { %v33_v0 = vld [vmem:[%s536_s1 + $0x18] sm:$0xff]  ;;  %v32_v1 = vld [vmem:[%s536_s1 + $0x10] sm:$0xff]  ;;  %v28_v2 = vld [vmem:[%s535_s0] sm:$0xff] }
   0x2   :  { %338 = vmatprep.subr.mxu0 %v33_v0  ;;  %v31_v3 = vld [vmem:[%s536_s1 + $0x8] sm:$0xff]  ;;  %346 = vmatprep.mubr.msk.f32.mxu0 %vm25_vm0, %v28_v2 }
   0x3   :  { %339 = vmatpush3.msra.mxu0 %v33_v0 }
   0x4   :  { %10 = vsyncpa [#allocation4], 0  ;;  %340 = vmatprep.subr.mxu0 %v32_v1  ;;  %v30_v4 = vld [vmem:[%s536_s1] sm:$0xff]  ;;  %v29_v5 = vld [vmem:[%s535_s0 + $0x8] sm:$0xff]  ;;  %v418_v22 = vmov 0.0   ;;  %s419_s10 = smov [#allocation3]  }
   0x5   :  { %341 = vmatpush3.msra.mxu0 %v32_v1  ;;  %v198_v6 = vld [vmem:[%s538_s3 + $0x78] sm:$0xff]  ;;  %v197_v7 = vld [vmem:[%s538_s3 + $0x70] sm:$0xff]  ;;  %v196_v8 = vld [vmem:[%s538_s3 + $0x68] sm:$0xff]  ;;  %27 = vst.msk [vmem:[#allocation2 + $0x8] sm:$0xff] %vm25_vm0, %v418_v22  ;;  %s299_s11 = sshll.u32 %s419_s10, 4  ;;  %s300_s11 = int_to_ptr.vmem [resolvable:$true] %s299_s11 }
   0x6   :  { %342 = vmatprep.subr.mxu0 %v31_v3  ;;  %349 = vmatprep.subr.mxu1 %v198_v6  ;;  %v195_v9 = vld [vmem:[%s538_s3 + $0x60] sm:$0xff]  ;;  %v194_v10 = vld [vmem:[%s538_s3 + $0x58] sm:$0xff]  ;;  %v193_v11 = vld [vmem:[%s538_s3 + $0x50] sm:$0xff]  ;;  %26 = vst.msk [vmem:[#allocation2] sm:$0xff] %vm25_vm0, %v418_v22  ;;  %s396_s12 = scalar_lea.vmem %s300_s11, 256  ;;  %p401_p1 = scmp.lt.s32.totalorder %s300_s11, %s300_s11 }
   0x7   :  { %343 = vmatpush3.msra.mxu0 %v31_v3  ;;  %350 = vmatpush3.msra.mxu1 %v198_v6  ;;  %v192_v12 = vld [vmem:[%s538_s3 + $0x48] sm:$0xff]  ;;  %v191_v13 = vld [vmem:[%s538_s3 + $0x40] sm:$0xff]  ;;  %v190_v14 = vld [vmem:[%s538_s3 + $0x38] sm:$0xff]  ;;  %p397_p0 = scmp.ne.s32.totalorder %s300_s11, %s396_s12  ;;  %p402_p2 = scmp.lt.s32.totalorder %s396_s12, %s396_s12 }
   0x8   :  { %344 = vmatprep.subr.mxu0 %v30_v4  ;;  %351 = vmatprep.subr.mxu1 %v197_v7  ;;  %v189_v15 = vld [vmem:[%s538_s3 + $0x30] sm:$0xff]  ;;  %v188_v16 = vld [vmem:[%s538_s3 + $0x28] sm:$0xff]  ;;  %v187_v17 = vld [vmem:[%s538_s3 + $0x20] sm:$0xff] }
   0x9   :  { %345 = vmatpush3.msra.mxu0 %v30_v4  ;;  %352 = vmatpush3.msra.mxu1 %v197_v7  ;;  %v186_v18 = vld [vmem:[%s538_s3 + $0x18] sm:$0xff]  ;;  %v185_v19 = vld [vmem:[%s538_s3 + $0x10] sm:$0xff]  ;;  %v184_v20 = vld [vmem:[%s538_s3 + $0x8] sm:$0xff]  ;;  %p403_p3 = por %p402_p2, %p401_p1 }
   0xa   :  { %347 = vmatmul.mubr.msk.f32.vlgmr.msra.gmra.mxu0 %vm25_vm0, %v29_v5  ;;  %353 = vmatprep.subr.mxu1 %v196_v8  ;;  %v183_v21 = vld [vmem:[%s538_s3] sm:$0xff] }
   0xb   :  { %354 = vmatpush3.msra.mxu1 %v196_v8  ;;  %v310_v23 = vld [vmem:[%s537_s2] ss:$0 sm:$0xff]  ;;  %p404_p4 = pnand %p403_p3, %p397_p0 }
   0xc   :  { %355 = vmatprep.subr.mxu1 %v195_v9 }
   0xd   :  { %356 = vmatpush3.msra.mxu1 %v195_v9  ;;  %v181_v22 = vld [vmem:[#allocation2] sm:$0xff] }
   0xe   :  { %357 = vmatprep.subr.mxu1 %v194_v10 }
   0xf   :  { %358 = vmatpush3.msra.mxu1 %v194_v10 }
  0x10   :  { %359 = vmatprep.subr.mxu1 %v193_v11 }
  0x11   :  { %360 = vmatpush3.msra.mxu1 %v193_v11 }
  0x12   :  { %361 = vmatprep.subr.mxu1 %v192_v12 }
  0x13   :  { %362 = vmatpush3.msra.mxu1 %v192_v12 }
  0x14   :  { %363 = vmatprep.subr.mxu1 %v191_v13 }
  0x15   :  { %364 = vmatpush3.msra.mxu1 %v191_v13 }
  0x16   :  { %365 = vmatprep.subr.mxu1 %v190_v14 }
  0x17   :  { %366 = vmatpush3.msra.mxu1 %v190_v14 }
  0x18   :  { %367 = vmatprep.subr.mxu1 %v189_v15 }
  0x19   :  { %368 = vmatpush3.msra.mxu1 %v189_v15 }
  0x1a   :  { %369 = vmatprep.subr.mxu1 %v188_v16 }
  0x1b   :  { %370 = vmatpush3.msra.mxu1 %v188_v16 }
  0x1c   :  { %371 = vmatprep.subr.mxu1 %v187_v17 }
  0x1d   :  { %372 = vmatpush3.msra.mxu1 %v187_v17 }
  0x1e   :  { %373 = vmatprep.subr.mxu1 %v186_v18 }
  0x1f   :  { %374 = vmatpush3.msra.mxu1 %v186_v18 }
  0x20   :  { %375 = vmatprep.subr.mxu1 %v185_v19 }
  0x21   :  { %376 = vmatpush3.msra.mxu1 %v185_v19 }
  0x22   :  { %377 = vmatprep.subr.mxu1 %v184_v20 }
  0x23   :  { %378 = vmatpush3.msra.mxu1 %v184_v20  ;;  %v182_v20 = vld [vmem:[#allocation2 + $0x8] sm:$0xff] }
  0x24   :  { %379 = vmatprep.subr.mxu1 %v183_v21 }
  0x25   :  { %380 = vmatpush3.msra.mxu1 %v183_v21 }
  0xca   :  { %v348_v24 = vpop.f32.mrf.mxu0 }
  0xcb   :  { %v120_v25 = vadd.f32 %v348_v24, %v310_v23 }
  0xcc   :  { %v114_v26 = vpop.f32.mrf.mxu0 }
  0xcd   :  { %v126_v27 = vmul.f32 0.70710677, %v120_v25  ;;  %v115_v28 = vadd.f32 %v310_v23, %v114_v26  ;;  %v124_v17 = vmul.f32 0.5, %v120_v25 }
  0xcf   :  { %v128_v29 = vand.u32 2147483647, %v126_v27  ;;  %v125_v30 = vmul.f32 0.70710677, %v115_v28  ;;  %vm172_vm1 = vcmp.lt.f32.partialorder %v126_v27, 0.0  ;;  %v123_v15 = vmul.f32 0.5, %v115_v28 }
  0xd0   :  { %v313_v27 = vld [vmem:[%s539_s4] ss:$0 sm:$0xff] }
  0xd1   :  { %v130_v31 = vmul.f32 0.3275911, %v128_v29  ;;  %v127_v32 = vand.u32 2147483647, %v125_v30  ;;  %v160_v36 = vsub.f32 0.0, %v128_v29  ;;  %vm171_vm2 = vcmp.lt.f32.partialorder %v125_v30, 0.0 }
  0xd3   :  { %v132_v33 = vadd.f32 1.0, %v130_v31  ;;  %v129_v34 = vmul.f32 0.3275911, %v127_v32  ;;  %v159_v39 = vsub.f32 0.0, %v127_v32  ;;  %v162_v42 = vmul.f32 %v160_v36, %v128_v29 }
  0xd5   :  { %388 = vrcp.f32 %v132_v33  ;;  %v131_v35 = vadd.f32 1.0, %v129_v34  ;;  %v161_v46 = vmul.f32 %v159_v39, %v127_v32  ;;  %v165_v47 = vmul.f32 1.442695, %v162_v42 }
  0xd7   :  { %390 = vrcp.f32 %v131_v35  ;;  %v163_v51 = vmul.f32 1.442695, %v161_v46 }
  0xd8   :  { %392 = vpow2.f32 %v165_v47 }
  0xd9   :  { %394 = vpow2.f32 %v163_v51 }
  0xe2   :  { %v389_v37 = vpop.eup %388 }
  0xe3   :  { %v136_v38 = vmul.f32 %v389_v37, %v132_v33 }
  0xe4   :  { %v391_v40 = vpop.eup %390 }
  0xe5   :  { %v138_v41 = vsub.f32 2.0, %v136_v38  ;;  %v135_v43 = vmul.f32 %v391_v40, %v131_v35  ;;  %v393_v2 = vpop.eup %392 }
  0xe6   :  { %v395_v6 = vpop.eup %394 }
  0xe7   :  { %v140_v44 = vmul.f32 %v389_v37, %v138_v41  ;;  %v137_v45 = vsub.f32 2.0, %v135_v43 }
  0xe9   :  { %v142_v48 = vmul.f32 1.0614054, %v140_v44  ;;  %v139_v49 = vmul.f32 %v391_v40, %v137_v45 }
  0xeb   :  { %v144_v50 = vadd.f32 -1.4531521, %v142_v48  ;;  %v141_v52 = vmul.f32 1.0614054, %v139_v49 }
  0xed   :  { %v146_v53 = vmul.f32 %v144_v50, %v140_v44  ;;  %v143_v54 = vadd.f32 -1.4531521, %v141_v52 }
  0xef   :  { %v148_v55 = vadd.f32 1.4214138, %v146_v53  ;;  %v145_v56 = vmul.f32 %v143_v54, %v139_v49 }
  0xf1   :  { %v150_v57 = vmul.f32 %v148_v55, %v140_v44  ;;  %v147_v58 = vadd.f32 1.4214138, %v145_v56 }
  0xf3   :  { %v152_v59 = vadd.f32 -0.28449672, %v150_v57  ;;  %v149_v60 = vmul.f32 %v147_v58, %v139_v49 }
  0xf5   :  { %v154_v61 = vmul.f32 %v152_v59, %v140_v44  ;;  %v151_v62 = vadd.f32 -0.28449672, %v149_v60 }
  0xf7   :  { %v156_v63 = vadd.f32 0.2548296, %v154_v61  ;;  %v153_v0 = vmul.f32 %v151_v62, %v139_v49 }
  0xf9   :  { %v158_v1 = vmul.f32 %v156_v63, %v140_v44  ;;  %v155_v3 = vadd.f32 0.2548296, %v153_v0 }
  0xfb   :  { %v168_v4 = vmul.f32 %v393_v2, %v158_v1  ;;  %v157_v5 = vmul.f32 %v155_v3, %v139_v49 }
  0xfd   :  { %v170_v7 = vsub.f32 1.0, %v168_v4  ;;  %v167_v8 = vmul.f32 %v395_v6, %v157_v5 }
  0xff   :  { %v174_v9 = vsub.f32 0.0, %v170_v7  ;;  %v169_v10 = vsub.f32 1.0, %v167_v8 }
 0x101   :  { %v176_v11 = vsel %vm172_vm1, %v174_v9, %v170_v7  ;;  %v173_v12 = vsub.f32 0.0, %v169_v10 }
 0x102   :  { %v178_v14 = vadd.f32 1.0, %v176_v11 }
 0x103   :  { %v175_v13 = vsel %vm171_vm2, %v173_v12, %v169_v10 }
 0x104   :  { %v177_v16 = vadd.f32 1.0, %v175_v13  ;;  %v180_v19 = vmul.f32 %v178_v14, %v124_v17 }
 0x106   :  { %v179_v18 = vmul.f32 %v177_v16, %v123_v15 }
 0x108   :  { %381 = vmatprep.mubr.f32.mxu1 %v179_v18 }
 0x109   :  { %382 = vmatmul.mubr.f32.vlgmr.msra.gmra.mxu1 %v180_v19 }
 0x1c9   :  { %v383_v21 = vpop.f32.mrf.mxu1 }
 0x1ca   :  { %v275_v23 = vadd.f32 %v383_v21, %v182_v20 }
 0x1cb   :  { %v265_v24 = vpop.f32.mrf.mxu1 }
 0x1cc   :  { %277 = vst.msk [vmem:[#allocation2 + $0x8] sm:$0xff] %vm25_vm0, %v275_v23  ;;  %v274_v26 = vadd.f32 %v265_v24, %v181_v22 }
 0x1ce   :  { %276 = vst.msk [vmem:[#allocation2] sm:$0xff] %vm25_vm0, %v274_v26 }
 0x1d3   :  { %v282_v25 = vld [vmem:[#allocation2 + $0x8] sm:$0xff] }
 0x1d4   :  { %v291_v28 = vadd.f32 %v313_v27, %v282_v25 }
 0x1d5   :  { %v281_v29 = vld [vmem:[#allocation2] sm:$0xff] }
 0x1d6   :  { %v290_v30 = vadd.f32 %v313_v27, %v281_v29  ;;  %293 = vst.msk [vmem:[#allocation3 + $0x8] sm:$0xff] %vm25_vm0, %v291_v28 }
 0x1d8   :  { %292 = vst.msk [vmem:[#allocation3] sm:$0xff] %vm25_vm0, %v290_v30 }
 0x1d9   :  { %407 = shalt.err (!%p404_p4)
}
 0x1da   :  { %s420_s13 = smov 128   ;;  %s421_s4 = smov 8  }
 0x1db   :  { %305 = dma.vmem_to_hbm [thread:$0]  %s300_s11, 256, %s540_s5, [#allocation4], %s420_s13, %s420_s13, %s421_s4  }
 0x1dc   :  { %416 = dma.done.wait [#allocation4], 256  }
 0x1dd   :  { %417 = vsyncadd [#allocation4], 4294967040 }
 0x1de   :  { %309 = vsyncpa [#allocation4], 1 }

</bundles_post_ra>
